<compile_context>
chip_gen: v6e
topology: v6e:2x2x1
jax: 0.10.0
libtpu: 0.0.40
codegen_flags: <defaults>
</compile_context>

<pallas_src>
import math

import jax
import jax.numpy as jnp
from jax.experimental import pallas as pl
from jax.experimental.pallas import tpu as pltpu


def _copy_kernel(x_ref, o_ref):
    # Straight lane-dense tile copy; squeeze itself is done by the wrapper's
    # (metadata-only) reshapes around the pallas_call.
    o_ref[...] = x_ref[...]


# Conservative fallbacks if the hardware query fails.
_DEFAULT_TILE_BYTES = 4 * 1024 * 1024
_DEFAULT_VMEM_LIMIT_BYTES = 32 * 1024 * 1024

# Below this size a kernel launch (+pipeline prologue) dwarfs the copy itself;
# the metadata path is strictly faster on every TPU generation.
_SMALL_BYPASS_BYTES = 256 * 1024


def _budgets():
    """Generation-aware (per-buffer tile bytes, vmem_limit_bytes)."""
    try:
        vmem = int(getattr(pltpu.get_tpu_info(), "vmem_capacity_bytes", 0))
    except Exception:  # pragma: no cover - defensive; query is best-effort
        vmem = 0
    if vmem >= 100 * 1024 * 1024:
        # v5e / v6e class: 128 MiB physical VMEM, single TensorCore.
        # 4 double-buffered tiles x 8 MiB = 32 MiB, limit 64 MiB leaves headroom.
        return 8 * 1024 * 1024, 64 * 1024 * 1024
    if vmem > 0:
        # v7x class: 64 MiB physical (halved per TC when core-sharded).
        return 6 * 1024 * 1024, 40 * 1024 * 1024
    return _DEFAULT_TILE_BYTES, _DEFAULT_VMEM_LIMIT_BYTES


def squeeze(x):
    """torch.Tensor.squeeze(): drop all size-1 dims. Pure metadata, no kernel."""
    out_shape = tuple(d for d in x.shape if d != 1)
    if out_shape == tuple(x.shape):
        return x
    return jnp.reshape(x, out_shape)


def squeeze_pallas(x, *, force_kernel=False, donate=False, tile_bytes=None):
    """Squeeze with an optional Pallas copy kernel.

    Default behavior matches `squeeze` (metadata-only) for anything small or
    not lane-dense factorable. Set force_kernel=True to route large, lane-dense
    inputs through the Pallas copy kernel.
    """
    in_shape = tuple(x.shape)
    out_shape = tuple(d for d in in_shape if d != 1)

    # Nothing to squeeze: identity, no kernel launch, no HBM traffic.
    if out_shape == in_shape:
        return x

    total = math.prod(out_shape) if out_shape else 1
    itemsize = jnp.dtype(x.dtype).itemsize

    # Degenerate / tiny squeezed outputs: metadata reshape is correct and free.
    if len(out_shape) < 2 or total == 0:
        return jnp.reshape(x, out_shape)
    if not force_kernel and total * itemsize < _SMALL_BYPASS_BYTES:
        return jnp.reshape(x, out_shape)

    # Present the contiguous data as a lane-dense 2-D slab so output stores are
    # full-lane unmasked vst (width = largest convenient multiple of 128).
    width = None
    for c in (512, 256, 128):
        if total % c == 0:
            width = c
            break
    if width is None:
        # No lane-dense factorization without padding -> free metadata reshape.
        return jnp.reshape(x, out_shape)

    rows = total // width
    x2d = jnp.reshape(x, (rows, width))  # metadata-only (contiguous)

    budget_bytes, vmem_limit = _budgets()
    if tile_bytes is not None:
        budget_bytes = int(tile_bytes)

    # Dtype-aware sublane packing: 8 rows for 32-bit, 16 for bf16/f16, 32 for
    # int8/fp8 -- avoids packed-row relayout / masked vst on tile edges.
    sub = 8 * max(1, 4 // itemsize)

    target_rows = max(sub, (budget_bytes // (width * itemsize)) // sub * sub)
    if rows <= target_rows:
        # Single block; block dims equal full array dims -> (8,128) rule OK.
        tile_r = rows
    else:
        tile_r = target_rows
        # Prefer a tile_r near the budget that divides `rows` evenly: removes
        # the masked partial last block entirely when possible.
        lo = max(sub, target_rows // 2)
        for cand in range(target_rows, lo - 1, -sub):
            if rows % cand == 0:
                tile_r = cand
                break

    grid = (pl.cdiv(rows, tile_r),)
    bytes_accessed = 2 * rows * width * itemsize

    out2d = pl.pallas_call(
        _copy_kernel,
        out_shape=jax.ShapeDtypeStruct((rows, width), x.dtype),
        grid=grid,
        in_specs=[pl.BlockSpec((tile_r, width), lambda i: (i, 0))],
        out_specs=pl.BlockSpec((tile_r, width), lambda i: (i, 0)),
        compiler_params=pltpu.CompilerParams(
            # Row tiles are independent: "parallel" lets v7x shard the copy
            # across both TensorCores; neutral on v5e/v6e (single TC).
            dimension_semantics=("parallel",),
            vmem_limit_bytes=vmem_limit,
        ),
        cost_estimate=pl.CostEstimate(
            flops=0, transcendentals=0, bytes_accessed=bytes_accessed
        ),
        # Only alias when the caller explicitly donates x (copy into itself).
        input_output_aliases={0: 0} if donate else {},
    )(x2d)

    return jnp.reshape(out2d, out_shape)  # metadata-only


if __name__ == "__main__":
    key = jax.random.PRNGKey(0)

    # Main case (module spec style): NCHW with singleton dim, (2,1,16,16) -> (2,16,16).
    # Small -> default path is the free metadata reshape (no kernel launch).
    x = jax.random.normal(key, (2, 1, 16, 16), dtype=jnp.float32)
    out = jax.block_until_ready(squeeze_pallas(x))
    ref = jnp.squeeze(x)
    assert out.shape == ref.shape, (out.shape, ref.shape)
    assert out.dtype == ref.dtype
    assert bool(jnp.array_equal(out, ref)), "values mismatch (main case)"

    # Same small input forced through the Pallas kernel (single lane-dense block).
    out_forced = jax.block_until_ready(squeeze_pallas(x, force_kernel=True))
    assert out_forced.shape == ref.shape
    assert bool(jnp.array_equal(out_forced, ref)), "values mismatch (forced small)"

    # Kernel case above the small-input bypass (~3 MiB), single or few tiles.
    x_big = jax.random.normal(key, (1, 2048, 1, 384), dtype=jnp.float32)
    out_big = jax.block_until_ready(squeeze_pallas(x_big))
    ref_big = jnp.squeeze(x_big)
    assert out_big.shape == ref_big.shape, (out_big.shape, ref_big.shape)
    assert bool(jnp.array_equal(out_big, ref_big)), "values mismatch (kernel case)"

    # Multi-tile case: force a small tile budget so grid > 1 (with a partial
    # last block) is exercised even at this modest size.
    out_tiled = jax.block_until_ready(
        squeeze_pallas(x_big, force_kernel=True, tile_bytes=512 * 1024)
    )
    assert out_tiled.shape == ref_big.shape
    assert bool(jnp.array_equal(out_tiled, ref_big)), "values mismatch (tiled case)"

    # bf16 exercises the dtype-aware sublane rounding (tile_r multiple of 16).
    x_bf16 = jax.random.normal(key, (1, 1024, 1, 512), dtype=jnp.bfloat16)
    out_bf16 = jax.block_until_ready(
        squeeze_pallas(x_bf16, force_kernel=True, tile_bytes=256 * 1024)
    )
    assert out_bf16.shape == (1024, 512)
    assert bool(jnp.array_equal(out_bf16, jnp.squeeze(x_bf16))), "values mismatch (bf16)"

    # No-op case: no size-1 dims -> identity, no kernel launch.
    x_noop = jax.random.normal(key, (2, 4, 16, 16), dtype=jnp.float32)
    out_noop = jax.block_until_ready(squeeze_pallas(x_noop))
    assert out_noop.shape == x_noop.shape
    assert bool(jnp.array_equal(out_noop, x_noop)), "values mismatch (no-op case)"

    # Degenerate case: squeezed output is 1-D -> free metadata reshape path.
    x_1d = jax.random.normal(key, (1, 8, 1), dtype=jnp.float32)
    out_1d = jax.block_until_ready(squeeze_pallas(x_1d))
    assert out_1d.shape == (8,)
    assert bool(jnp.array_equal(out_1d, jnp.squeeze(x_1d))), "values mismatch (1-D case)"

    print("KERNEL_OK")
</pallas_src>

<mosaic_0001>
module attributes {stable_mosaic.version = 11 : i64} {
  func.func @_copy_kernel(%arg0: i32, %arg1: memref<1x512xf32, #tpu.memory_space<vmem>>, %arg2: memref<1x512xf32, #tpu.memory_space<vmem>>) attributes {dimension_semantics = [#tpu.dimension_semantics<parallel>], iteration_bounds = array<i64: 1>, scalar_prefetch = 0 : i64, scratch_operands = 0 : i64, tpu.core_type = #tpu.core_type<tc>, window_params = [{transform_indices = @transform_0, window_bounds = array<i64: 1, 512>}, {transform_indices = @transform_1, window_bounds = array<i64: 1, 512>}]} {
    %c0 = arith.constant 0 : index
    %c0_0 = arith.constant 0 : index
    %0 = vector.load %arg1[%c0, %c0_0] : memref<1x512xf32, #tpu.memory_space<vmem>>, vector<1x512xf32>
    %c0_1 = arith.constant 0 : index
    %c0_2 = arith.constant 0 : index
    %1 = vector.load %arg2[%c0_1, %c0_2] : memref<1x512xf32, #tpu.memory_space<vmem>>, vector<1x512xf32>
    tpu.vector_store %arg2[%c0_1, %c0_2], %0 {strides = array<i32>} : memref<1x512xf32, #tpu.memory_space<vmem>>, vector<1x512xf32>,
    return
  }
  func.func @transform_0(%arg0: i32) -> (i32, i32) {
    %c0_i32 = arith.constant 0 : i32
    %c0_i32_0 = arith.constant 0 : i32
    return %arg0, %c0_i32 : i32, i32
  }
  func.func @transform_1(%arg0: i32) -> (i32, i32) {
    %c0_i32 = arith.constant 0 : i32
    %c0_i32_0 = arith.constant 0 : i32
    return %arg0, %c0_i32 : i32, i32
  }
}

</mosaic_0001>

<bundles_post_ra>
// kernel: tpu_custom_call.1
= control target key start
LH: loop header
LB: loop body
LE: loop exit
PB: predicated region body
PF: predicated region fallthrough
CT: control target
= control target key end

     0   :  { %6 = vsyncpa [#allocation3], 0  ;;  %s106_s0 = inlined_call_operand.hbm [shape: f32[1,512], index: 0, kind: input, shape index: {}]   ;;  %s107_s1 = inlined_call_operand.hbm [shape: f32[1,512], index: 1, kind: output, shape index: {}]  }
   0x1   :  { %7 = vsyncpa [#allocation4], 0  ;;  %s88_s6 = smov [#allocation2]  }
   0x2   :  { %s14_s7 = sshll.u32 %s88_s6, 4  ;;  %s15_s7 = int_to_ptr.vmem [resolvable:$true] %s14_s7 }
   0x3   :  { %s52_s8 = scalar_lea.vmem %s15_s7, 64  ;;  %p57_p1 = scmp.lt.s32.totalorder %s15_s7, %s15_s7 }
   0x4   :  { %p53_p0 = scmp.ne.s32.totalorder %s15_s7, %s52_s8  ;;  %p58_p2 = scmp.lt.s32.totalorder %s52_s8, %s52_s8 }
   0x6   :  { %p59_p3 = por %p58_p2, %p57_p1 }
   0x8   :  { %p60_p4 = pnand %p59_p3, %p53_p0 }
   0xa   :  { %63 = shalt.err (!%p60_p4)
}
   0xb   :  { %17 = dma.hbm_to_vmem [thread:$0]  %s106_s0, 64, %s15_s7, [#allocation3]  }
   0xc   :  { %84 = dma.done.wait [#allocation3], 64  }
   0xd   :  { %85 = vsyncadd [#allocation3], 4294967232  ;;  %v22_v0 = vlaneseq  ;;  %s89_s11 = smov [#allocation5]   ;;  %v21_v1 = vld [vmem:[#allocation2] sm:$0xf] }
   0xe   :  { %s33_s12 = sshll.u32 %s89_s11, 4  ;;  %s34_s12 = int_to_ptr.vmem [resolvable:$true] %s33_s12 }
   0xf   :  { %vm24_vm0 = vcmp.lt.s32.totalorder %v22_v0, 512  ;;  %s64_s13 = scalar_lea.vmem %s34_s12, 64  ;;  %p69_p6 = scmp.lt.s32.totalorder %s34_s12, %s34_s12 }
  0x10   :  { %26 = vst.msk [vmem:[#allocation5] sm:$0xf] %vm24_vm0, %v21_v1  ;;  %p65_p5 = scmp.ne.s32.totalorder %s34_s12, %s64_s13  ;;  %p70_p7 = scmp.lt.s32.totalorder %s64_s13, %s64_s13 }
  0x12   :  { %p71_p8 = por %p70_p7, %p69_p6 }
  0x14   :  { %p72_p9 = pnand %p71_p8, %p65_p5 }
  0x16   :  { %75 = shalt.err (!%p72_p9)
}
  0x17   :  { %36 = dma.vmem_to_hbm [thread:$0]  %s34_s12, 64, %s107_s1, [#allocation4]  }
  0x18   :  { %86 = dma.done.wait [#allocation4], 64  }
  0x19   :  { %87 = vsyncadd [#allocation4], 4294967232 }
  0x1a   :  { %40 = vsyncpa [#allocation3], 1 }
  0x1b   :  { %41 = vsyncpa [#allocation4], 1 }

</bundles_post_ra>
